<compile_context>
chip_gen: v5e
topology: v5e:2x2
jax: 0.10.0
libtpu: 0.0.40
codegen_flags: <defaults>
</compile_context>

<pallas_src>
import jax
import jax.numpy as jnp
from jax.experimental import pallas as pl
from jax.experimental.pallas import tpu as pltpu

FEAT = 10  # nn.Linear(10, 10)


def _fused_linear_kernel(x_ref, w_ref, b_ref, o_ref):
    # x: (TM, FEAT) f32, w: (FEAT, FEAT) f32 (stored (in, out)), b: (1, FEAT) f32
    # One MXU push with f32 accumulation + one broadcast bias add per batch tile.
    o_ref[...] = (
        jnp.dot(x_ref[...], w_ref[...], preferred_element_type=jnp.float32)
        + b_ref[...]
    )


def fold_params(params):
    """One-time algebraic fold of the 5 checkpointed Linears (hoisted out of the
    per-call forward path).  params: name -> (W (in,out), b (1,out))."""
    coeffs = {"a": 1.0, "b": 2.0, "c": 1.0, "d": 1.0, "e": 1.0}
    w_sum = sum(coeffs[n] * params[n][0] for n in ("a", "b", "c", "d", "e"))
    b_sum = sum(coeffs[n] * params[n][1] for n in ("a", "b", "c", "d", "e"))
    return jnp.asarray(w_sum, jnp.float32), jnp.asarray(b_sum, jnp.float32)


def nested_ckpt_forward(x, w_sum, b_sum, *, tm=1024):
    """x: (B, FEAT) float32; w_sum: (FEAT, FEAT) stored (in, out); b_sum: (1, FEAT).
    Returns a(x) + 2*b(x) + c(x) + d(x) + e(x), matching MyModule.forward."""
    B = x.shape[0]

    # Batch tile: tm rows (multiple of 8) when B is large; the full extent when B
    # is small (a full-extent block is always legal, even if not 8-aligned).
    tm_eff = tm if B > tm else B
    grid = (pl.cdiv(B, tm_eff),)

    bytes_accessed = (
        x.size * 4            # x read
        + w_sum.size * 4      # weights (read once, resident across tiles)
        + b_sum.size * 4      # bias
        + B * FEAT * 4        # output write (un-padded)
    )
    cost = pl.CostEstimate(
        flops=2 * B * FEAT * FEAT,
        transcendentals=0,
        bytes_accessed=bytes_accessed,
    )

    return pl.pallas_call(
        _fused_linear_kernel,
        out_shape=jax.ShapeDtypeStruct((B, FEAT), jnp.float32),
        grid_spec=pltpu.PrefetchScalarGridSpec(
            num_scalar_prefetch=0,
            grid=grid,
            in_specs=[
                pl.BlockSpec((tm_eff, FEAT), lambda i: (i, 0)),  # x: streamed per tile
                pl.BlockSpec((FEAT, FEAT), lambda i: (0, 0)),    # w: resident (const index)
                pl.BlockSpec((1, FEAT), lambda i: (0, 0)),       # b: resident (const index)
            ],
            out_specs=pl.BlockSpec((tm_eff, FEAT), lambda i: (i, 0)),
        ),
        compiler_params=pltpu.CompilerParams(
            dimension_semantics=("parallel",),  # v7x megacore; no-op on v5e/v6e
        ),
        cost_estimate=cost,
    )(x, w_sum, b_sum)


def init_params(key):
    """nn.Linear-style init: W (out,in) ~ U(-1/sqrt(fan_in), ...), b (out,).
    Stored transposed as (in, out) for the kernel, bias as (1, FEAT)."""
    params = {}
    bound = 1.0 / jnp.sqrt(jnp.float32(FEAT))
    for name in ("a", "b", "c", "d", "e"):
        key, kw, kb = jax.random.split(key, 3)
        w_pt = jax.random.uniform(kw, (FEAT, FEAT), jnp.float32, -bound, bound)  # (out, in)
        b_pt = jax.random.uniform(kb, (FEAT,), jnp.float32, -bound, bound)
        params[name] = (w_pt.T, b_pt.reshape(1, FEAT))
    return params


def reference_forward(x, params):
    """Mirror the module structure exactly (checkpoints are identity on values)."""
    def lin(name):
        w, b = params[name]
        return x @ w + b

    a = lin("a"); b_ = lin("b"); c = lin("c"); d = lin("d"); e = lin("e")
    ckpt_0_0_0 = a + b_          # checkpoint_0_0_0 = a(x) + b(x)
    ckpt_0_0_1 = b_ + c          # checkpoint_0_0_1 = b(x) + c(x)
    ckpt_0_0 = ckpt_0_0_0 + ckpt_0_0_1
    ckpt_0_1 = d                 # checkpoint_0_1 = d(x)
    return ckpt_0_0 + ckpt_0_1 + e


if __name__ == "__main__":
    key = jax.random.PRNGKey(0)
    kx, kp = jax.random.split(key)

    B = 16  # small batch, multiple of 8 sublanes
    x = jax.random.normal(kx, (B, FEAT), jnp.float32)
    params = init_params(kp)

    # Fold once (outside the hot path), then call the tiled kernel.
    w_sum, b_sum = fold_params(params)
    out = nested_ckpt_forward(x, w_sum, b_sum)
    out = jax.block_until_ready(out)

    ref = reference_forward(x, params)
    assert out.shape == (B, FEAT)
    assert jnp.allclose(out, ref, atol=1e-5, rtol=1e-5), "mismatch vs reference"

    print("KERNEL_OK")
</pallas_src>

<mosaic_0001>
module attributes {stable_mosaic.version = 11 : i64} {
  func.func @_fused_linear_kernel(%arg0: i32, %arg1: memref<16x10xf32, #tpu.memory_space<vmem>>, %arg2: memref<10x10xf32, #tpu.memory_space<vmem>>, %arg3: memref<1x10xf32, #tpu.memory_space<vmem>>, %arg4: memref<16x10xf32, #tpu.memory_space<vmem>>) attributes {dimension_semantics = [#tpu.dimension_semantics<parallel>], iteration_bounds = array<i64: 1>, scalar_prefetch = 0 : i64, scratch_operands = 0 : i64, tpu.core_type = #tpu.core_type<tc>, window_params = [{transform_indices = @transform_0, window_bounds = array<i64: 16, 10>}, {pipeline_mode = #tpu.pipeline_mode<synchronous>, transform_indices = @transform_1, window_bounds = array<i64: 10, 10>}, {pipeline_mode = #tpu.pipeline_mode<synchronous>, transform_indices = @transform_2, window_bounds = array<i64: 1, 10>}, {transform_indices = @transform_3, window_bounds = array<i64: 16, 10>}]} {
    %c0 = arith.constant 0 : index
    %c0_0 = arith.constant 0 : index
    %0 = vector.load %arg1[%c0, %c0_0] : memref<16x10xf32, #tpu.memory_space<vmem>>, vector<16x10xf32>
    %c0_1 = arith.constant 0 : index
    %c0_2 = arith.constant 0 : index
    %1 = vector.load %arg2[%c0_1, %c0_2] : memref<10x10xf32, #tpu.memory_space<vmem>>, vector<10x10xf32>
    %cst = arith.constant dense<0.000000e+00> : vector<16x10xf32>
    %2 = tpu.matmul %0, %1, %cst {dimension_numbers = #tpu.dot_dimension_numbers<[1], [0], [0], [1], [0, 0, 1, 1], [], []>} : vector<16x10xf32>, vector<10x10xf32>, vector<16x10xf32> -> vector<16x10xf32>
    %c0_3 = arith.constant 0 : index
    %c0_4 = arith.constant 0 : index
    %3 = vector.load %arg3[%c0_3, %c0_4] : memref<1x10xf32, #tpu.memory_space<vmem>>, vector<1x10xf32>
    %4 = vector.broadcast %3 : vector<1x10xf32> to vector<16x10xf32>
    %5 = arith.addf %2, %4 : vector<16x10xf32>
    %c0_5 = arith.constant 0 : index
    %c0_6 = arith.constant 0 : index
    %6 = vector.load %arg4[%c0_5, %c0_6] : memref<16x10xf32, #tpu.memory_space<vmem>>, vector<16x10xf32>
    tpu.vector_store %arg4[%c0_5, %c0_6], %5 {strides = array<i32>} : memref<16x10xf32, #tpu.memory_space<vmem>>, vector<16x10xf32>,
    return
  }
  func.func @transform_0(%arg0: i32) -> (i32, i32) {
    %c0_i32 = arith.constant 0 : i32
    %c0_i32_0 = arith.constant 0 : i32
    return %arg0, %c0_i32 : i32, i32
  }
  func.func @transform_1(%arg0: i32) -> (i32, i32) {
    %c0_i32 = arith.constant 0 : i32
    %c0_i32_0 = arith.constant 0 : i32
    %c0_i32_1 = arith.constant 0 : i32
    return %c0_i32, %c0_i32_0 : i32, i32
  }
  func.func @transform_2(%arg0: i32) -> (i32, i32) {
    %c0_i32 = arith.constant 0 : i32
    %c0_i32_0 = arith.constant 0 : i32
    %c0_i32_1 = arith.constant 0 : i32
    return %c0_i32, %c0_i32_0 : i32, i32
  }
  func.func @transform_3(%arg0: i32) -> (i32, i32) {
    %c0_i32 = arith.constant 0 : i32
    %c0_i32_0 = arith.constant 0 : i32
    return %arg0, %c0_i32 : i32, i32
  }
}

</mosaic_0001>

<bundles_post_ra>
// kernel: tpu_custom_call.1
= control target key start
LH: loop header
LB: loop body
LE: loop exit
PB: predicated region body
PF: predicated region fallthrough
CT: control target
= control target key end

     0   :  { %8 = vsyncpa [#allocation3], 0  ;;  %s250_s0 = inlined_call_operand.hbm [shape: f32[16,10], index: 0, kind: input, shape index: {}]   ;;  %s251_s1 = inlined_call_operand.hbm [shape: f32[10,10], index: 1, kind: input, shape index: {}]   ;;  %s252_s2 = inlined_call_operand.vmem [shape: f32[1,10], index: 2, kind: input, shape index: {}]   ;;  %s253_s3 = inlined_call_operand.hbm [shape: f32[16,10], index: 3, kind: output, shape index: {}]  }
   0x1   :  { %9 = vsyncpa [#allocation6], 0 }
   0x2   :  { %10 = vsyncpa [#allocation4], 0  ;;  %s15_s14 = sshll.u32 %s250_s0, 4  ;;  %s200_s15 = smov [#allocation2]   ;;  %s16_s14 = int_to_ptr.hbm [resolvable:$true] %s15_s14 }
   0x3   :  { %s17_s16 = sshll.u32 %s200_s15, 4  ;;  %s28_s19 = sshll.u32 %s251_s1, 4  ;;  %s18_s16 = int_to_ptr.vmem [resolvable:$true] %s17_s16  ;;  %s29_s19 = int_to_ptr.hbm [resolvable:$true] %s28_s19 }
   0x4   :  { %s201_s20 = smov 128   ;;  %s202_s21 = smov 8  }
   0x5   :  { %23 = dma.hbm_to_vmem [thread:$0]  %s16_s14, 256, %s18_s16, [#allocation3], %s201_s20, %s201_s20, %s202_s21  }
   0x6   :  { %s203_s22 = smov [#allocation5]  }
   0x7   :  { %s30_s23 = sshll.u32 %s203_s22, 4  ;;  %s31_s23 = int_to_ptr.vmem [resolvable:$true] %s30_s23 }
   0x8   :  { %36 = dma.hbm_to_vmem [thread:$0]  %s29_s19, 256, %s31_s23, [#allocation6], %s201_s20, %s201_s20, %s202_s21  }
   0x9   :  { %194 = dma.done.wait [#allocation3], 256  }
   0xa   :  { %195 = vsyncadd [#allocation3], 4294967040 }
   0xb   :  { %196 = dma.done.wait [#allocation6], 256  }
   0xc   :  { %197 = vsyncadd [#allocation6], 4294967040  ;;  %vm62_vm0 = vcmask 1041408   ;;  %v50_v0 = vld [vmem:[#allocation5 + $0x8] sm:$0x3]  ;;  %v49_v1 = vld [vmem:[#allocation5] sm:$0xff] }
   0xd   :  { %111 = vmatpush.msk.msra.mxu0 %vm62_vm0, %v50_v0  ;;  %114 = vmatpush.msk.msra.mxu1 %vm62_vm0, %v50_v0  ;;  %v47_v2 = vld [vmem:[#allocation2] sm:$0xff]  ;;  %vm55_vm1 = vcmask 80896   ;;  %v48_v3 = vld [vmem:[#allocation2 + $0x8] sm:$0xff]  ;;  %s204_s24 = smov [#allocation7]   ;;  %s97_s28 = sshll.u32 %s253_s3, 4  ;;  %s98_s28 = int_to_ptr.hbm [resolvable:$true] %s97_s28 }
   0xe   :  { %v121_v4 = vld [vmem:[%s252_s2] ss:$0 sm:$0xff]  ;;  %s95_s25 = sshll.u32 %s204_s24, 4  ;;  %s96_s25 = int_to_ptr.vmem [resolvable:$true] %s95_s25 }
   0xf   :  { %81 = vmatpush.msra.mxu0 %v49_v1  ;;  %115 = vmatpush.msra.mxu1 %v49_v1 }
  0x10   :  { %112 = vmatmul.msk.f32.vlgmr.msra.gmra.mxu0 %vm55_vm1, %v47_v2  ;;  %113 = vmatmul.msk.f32.vlgmr.msra.gmra.mxu1 %vm55_vm1, %v48_v3 }
  0x8d   :  { %v83_v5 = vpop.f32.mrf.mxu0  ;;  %v86_v6 = vpop.f32.mrf.mxu1 }
  0x8e   :  { %v84_v7 = vadd.f32 %v121_v4, %v83_v5  ;;  %v87_v8 = vadd.f32 %v121_v4, %v86_v6 }
  0x90   :  { %89 = vst.msk [vmem:[#allocation7] sm:$0xff] %vm55_vm1, %v84_v7 }
  0x91   :  { %90 = vst.msk [vmem:[#allocation7 + $0x8] sm:$0xff] %vm55_vm1, %v87_v8 }
  0x92   :  { %103 = dma.vmem_to_hbm [thread:$0]  %s96_s25, 256, %s98_s28, [#allocation4], %s201_s20, %s201_s20, %s202_s21  }
  0x93   :  { %198 = dma.done.wait [#allocation4], 256  }
  0x94   :  { %199 = vsyncadd [#allocation4], 4294967040 }
  0x95   :  { %108 = vsyncpa [#allocation3], 1 }
  0x96   :  { %109 = vsyncpa [#allocation6], 1 }
  0x97   :  { %110 = vsyncpa [#allocation4], 1 }

</bundles_post_ra>
